<compile_context>
chip_gen: v7x
topology: tpu7x:2x2x1
jax: 0.10.0
libtpu: 0.0.40
codegen_flags: <defaults>
</compile_context>

<pallas_src>
import jax
import jax.numpy as jnp
from jax.experimental import pallas as pl
from jax.experimental.pallas import tpu as pltpu

EPS = 1e-5

# Row offsets inside the packed weight slab (all multiples of 8 -> aligned slices).
_W_BB = slice(0, 16)      # (16, 128)  backbone weight, K padded 9 -> 16
_W_1  = slice(16, 144)    # (128, 128) fc1 weight, N padded 64 -> 128
_W_2  = slice(144, 272)   # (128, 128) fc2 weight, padded 64x64 -> 128x128
_W_3  = slice(272, 400)   # (128, 128) fc3 weight, only column 0 live
_WPACK_ROWS = 400


def net_kernel(x_ref, w_ref, v_ref, o_ref):
    B = x_ref.shape[0]
    inv_b = 1.0 / B                       # static (shapes are compile-time)

    x = x_ref[...]                        # (B, 16)
    v = v_ref[...]                        # (8, 128) packed per-feature vectors
    g0, be0 = v[0:1, :], v[1:2, :]
    g1, be1 = v[2:3, :], v[3:4, :]
    g2, be2 = v[4:5, :], v[5:6, :]
    b3_row = v[6:7, :]                    # b3 at lane 0, zeros elsewhere

    def bn_relu(h, g, b):
        # Fused training-mode BN + ReLU: one pass over h, single FMA per element.
        s1 = jnp.sum(h, axis=0, keepdims=True)
        s2 = jnp.sum(h * h, axis=0, keepdims=True)
        mu = s1 * inv_b
        var = s2 * inv_b - mu * mu        # biased variance (E[h^2] - mu^2)
        scale = g * jax.lax.rsqrt(var + EPS)
        shift = b - mu * scale
        return jnp.maximum(h * scale + shift, 0.0)

    # backbone (Linear(9,128) or im2col'd Conv2d(1,128,3)); bias folded out by BN.
    h = jnp.dot(x, w_ref[_W_BB, :], preferred_element_type=jnp.float32)
    h = bn_relu(h, g0, be0)                                            # (B, 128)

    # fc1 (128 -> 64, padded to 128); bias folded out by BN.
    h = jnp.dot(h, w_ref[_W_1, :], preferred_element_type=jnp.float32)
    h = bn_relu(h, g1, be1)                                            # (B, 128)

    # fc2 (64 -> 64, padded to 128); bias folded out by BN.
    h = jnp.dot(h, w_ref[_W_2, :], preferred_element_type=jnp.float32)
    h = bn_relu(h, g2, be2)                                            # (B, 128)

    # fc3 (64 -> 1) + sigmoid; lane-dense (B,128) output, only column 0 is live.
    logits = jnp.dot(h, w_ref[_W_3, :], preferred_element_type=jnp.float32) + b3_row
    o_ref[...] = jax.nn.sigmoid(logits)                                # (B, 128)


def init_params(key, ntype):
    """Deterministic parameter init (shapes follow the PyTorch module)."""
    ks = jax.random.split(key, 8)
    if ntype == 'Linear':
        w_bb = jax.random.normal(ks[0], (9, 128), jnp.float32) * 0.2   # Linear(9,128) (in,out)
    elif ntype == 'Conv':
        w_conv = jax.random.normal(ks[0], (128, 1, 3, 3), jnp.float32) * 0.2  # Conv2d(1,128,3)
        w_bb = w_conv.reshape(128, 9).T                                # im2col-equivalent (9,128)
    else:
        raise ValueError('ntype can only take "Linear" and "Conv"')
    return dict(
        w_bb=w_bb,
        b_bb=jax.random.normal(ks[1], (128,), jnp.float32) * 0.1,
        g0=jnp.ones((128,), jnp.float32),  be0=jnp.zeros((128,), jnp.float32),
        w1=jax.random.normal(ks[2], (128, 64), jnp.float32) * 0.1,
        b1=jax.random.normal(ks[3], (64,), jnp.float32) * 0.1,
        g1=jnp.ones((64,), jnp.float32),   be1=jnp.zeros((64,), jnp.float32),
        w2=jax.random.normal(ks[4], (64, 64), jnp.float32) * 0.1,
        b2=jax.random.normal(ks[5], (64,), jnp.float32) * 0.1,
        g2=jnp.ones((64,), jnp.float32),   be2=jnp.zeros((64,), jnp.float32),
        w3=jax.random.normal(ks[6], (64, 1), jnp.float32) * 0.1,
        b3=jax.random.normal(ks[7], (1,), jnp.float32) * 0.1,
    )


def pack_params(params):
    """Pack all weights into one (400,128) slab and all vectors into one (8,128) slab.

    Zero padding is chosen so padded feature columns remain exactly 0 through the
    whole chain (gamma padded with 0 -> BN output 0 -> ReLU 0 -> w3 pad rows 0).
    """
    w_bb_p = jnp.zeros((16, 128), jnp.float32).at[:9, :].set(params['w_bb'])
    w1_p = jnp.zeros((128, 128), jnp.float32).at[:, :64].set(params['w1'])
    w2_p = jnp.zeros((128, 128), jnp.float32).at[:64, :64].set(params['w2'])
    w3_p = jnp.zeros((128, 128), jnp.float32).at[:64, 0:1].set(params['w3'])
    wpack = jnp.concatenate([w_bb_p, w1_p, w2_p, w3_p], axis=0)        # (400, 128)
    assert wpack.shape[0] == _WPACK_ROWS

    def pad128(v):
        return jnp.zeros((128,), jnp.float32).at[:v.shape[0]].set(v)

    vpack = jnp.stack([
        pad128(params['g0']), pad128(params['be0']),
        pad128(params['g1']), pad128(params['be1']),
        pad128(params['g2']), pad128(params['be2']),
        pad128(params['b3']),                       # b3 scalar -> lane 0
        jnp.zeros((128,), jnp.float32),             # pad to 8 sublanes
    ], axis=0)                                      # (8, 128)
    return wpack, vpack


def net_forward(x, params, ntype):
    """Forward pass matching Net(ntype).forward (training-mode BN)."""
    if ntype == 'Conv':
        # NCHW (B,1,3,3) -> im2col flatten (B,9); 3x3 conv, pad 0, on 3x3 input == dot.
        x = x.reshape(x.shape[0], 9)
    B = x.shape[0]
    x_p = jnp.zeros((B, 16), jnp.float32).at[:, :9].set(x)   # pad K 9 -> 16

    wpack, vpack = pack_params(params)

    out = pl.pallas_call(
        net_kernel,
        out_shape=jax.ShapeDtypeStruct((B, 128), jnp.float32),
        in_specs=[pl.BlockSpec(memory_space=pltpu.MemorySpace.VMEM)] * 3,
        out_specs=pl.BlockSpec(memory_space=pltpu.MemorySpace.VMEM),
    )(x_p, wpack, vpack)
    return out[:, 0]   # only column 0 is the real logit -> (B,)


def net_forward_ref(x, params, ntype):
    """Pure-JAX reference (with the original pre-BN biases) for correctness checking."""
    if ntype == 'Conv':
        x = x.reshape(x.shape[0], 9)

    def bn_relu(h, g, b):
        mu = jnp.mean(h, axis=0, keepdims=True)
        var = jnp.mean((h - mu) ** 2, axis=0, keepdims=True)
        return jnp.maximum((h - mu) / jnp.sqrt(var + EPS) * g + b, 0.0)

    h = bn_relu(x @ params['w_bb'] + params['b_bb'], params['g0'], params['be0'])
    h = bn_relu(h @ params['w1'] + params['b1'], params['g1'], params['be1'])
    h = bn_relu(h @ params['w2'] + params['b2'], params['g2'], params['be2'])
    return jax.nn.sigmoid(h @ params['w3'] + params['b3'])[:, 0]


if __name__ == "__main__":
    key = jax.random.PRNGKey(0)
    k_lin, k_conv, k_p = jax.random.split(key, 3)
    B = 8

    # 'Linear' variant: x is (B, 9)
    x_lin = jax.random.normal(k_lin, (B, 9), jnp.float32)
    params_lin = init_params(k_p, 'Linear')
    out_lin = jax.block_until_ready(net_forward(x_lin, params_lin, 'Linear'))
    ref_lin = net_forward_ref(x_lin, params_lin, 'Linear')
    assert out_lin.shape == (B,)
    assert jnp.allclose(out_lin, ref_lin, atol=1e-4, rtol=1e-4)

    # 'Conv' variant: x is (B, 1, 3, 3) NCHW
    x_conv = jax.random.normal(k_conv, (B, 1, 3, 3), jnp.float32)
    params_conv = init_params(k_p, 'Conv')
    out_conv = jax.block_until_ready(net_forward(x_conv, params_conv, 'Conv'))
    ref_conv = net_forward_ref(x_conv, params_conv, 'Conv')
    assert out_conv.shape == (B,)
    assert jnp.allclose(out_conv, ref_conv, atol=1e-4, rtol=1e-4)

    print("KERNEL_OK")
</pallas_src>

<mosaic_0001>
module attributes {stable_mosaic.version = 11 : i64} {
  func.func @net_kernel(%arg0: memref<8x16xf32, #tpu.memory_space<vmem>>, %arg1: memref<400x128xf32, #tpu.memory_space<vmem>>, %arg2: memref<8x128xf32, #tpu.memory_space<vmem>>, %arg3: memref<8x128xf32, #tpu.memory_space<vmem>>) attributes {dimension_semantics = [], scalar_prefetch = 0 : i64, scratch_operands = 0 : i64, tpu.core_type = #tpu.core_type<tc>} {
    %c0 = arith.constant 0 : index
    %c0_0 = arith.constant 0 : index
    %0 = vector.load %arg0[%c0, %c0_0] : memref<8x16xf32, #tpu.memory_space<vmem>>, vector<8x16xf32>
    %c0_1 = arith.constant 0 : index
    %c0_2 = arith.constant 0 : index
    %1 = vector.load %arg2[%c0_1, %c0_2] : memref<8x128xf32, #tpu.memory_space<vmem>>, vector<8x128xf32>
    %2 = vector.extract_strided_slice %1 {offsets = [0, 0], sizes = [1, 128], strides = [1, 1]} : vector<8x128xf32> to vector<1x128xf32>
    %3 = vector.extract_strided_slice %1 {offsets = [1, 0], sizes = [1, 128], strides = [1, 1]} : vector<8x128xf32> to vector<1x128xf32>
    %4 = vector.extract_strided_slice %1 {offsets = [2, 0], sizes = [1, 128], strides = [1, 1]} : vector<8x128xf32> to vector<1x128xf32>
    %5 = vector.extract_strided_slice %1 {offsets = [3, 0], sizes = [1, 128], strides = [1, 1]} : vector<8x128xf32> to vector<1x128xf32>
    %6 = vector.extract_strided_slice %1 {offsets = [4, 0], sizes = [1, 128], strides = [1, 1]} : vector<8x128xf32> to vector<1x128xf32>
    %7 = vector.extract_strided_slice %1 {offsets = [5, 0], sizes = [1, 128], strides = [1, 1]} : vector<8x128xf32> to vector<1x128xf32>
    %8 = vector.extract_strided_slice %1 {offsets = [6, 0], sizes = [1, 128], strides = [1, 1]} : vector<8x128xf32> to vector<1x128xf32>
    %c0_3 = arith.constant 0 : index
    %c0_4 = arith.constant 0 : index
    %9 = vector.load %arg1[%c0_3, %c0_4] : memref<400x128xf32, #tpu.memory_space<vmem>>, vector<16x128xf32>
    %cst = arith.constant dense<0.000000e+00> : vector<8x128xf32>
    %10 = tpu.matmul %0, %9, %cst {dimension_numbers = #tpu.dot_dimension_numbers<[1], [0], [0], [1], [0, 0, 1, 1], [], []>} : vector<8x16xf32>, vector<16x128xf32>, vector<8x128xf32> -> vector<8x128xf32>
    %cst_5 = arith.constant dense<0.000000e+00> : vector<128xf32>
    %11 = vector.multi_reduction <add>, %10, %cst_5 [0] : vector<8x128xf32> to vector<128xf32>
    %12 = vector.shape_cast %11 : vector<128xf32> to vector<1x128xf32>
    %13 = arith.mulf %10, %10 : vector<8x128xf32>
    %cst_6 = arith.constant dense<0.000000e+00> : vector<128xf32>
    %14 = vector.multi_reduction <add>, %13, %cst_6 [0] : vector<8x128xf32> to vector<128xf32>
    %15 = vector.shape_cast %14 : vector<128xf32> to vector<1x128xf32>
    %cst_7 = arith.constant 1.250000e-01 : f32
    %16 = vector.broadcast %cst_7 : f32 to vector<1x128xf32>
    %17 = arith.mulf %12, %16 : vector<1x128xf32>
    %cst_8 = arith.constant 1.250000e-01 : f32
    %18 = vector.broadcast %cst_8 : f32 to vector<1x128xf32>
    %19 = arith.mulf %15, %18 : vector<1x128xf32>
    %20 = arith.mulf %17, %17 : vector<1x128xf32>
    %21 = arith.subf %19, %20 : vector<1x128xf32>
    %cst_9 = arith.constant 9.99999974E-6 : f32
    %22 = vector.broadcast %cst_9 : f32 to vector<1x128xf32>
    %23 = arith.addf %21, %22 : vector<1x128xf32>
    %24 = math.rsqrt %23 : vector<1x128xf32>
    %25 = arith.mulf %2, %24 : vector<1x128xf32>
    %26 = arith.mulf %17, %25 : vector<1x128xf32>
    %27 = arith.subf %3, %26 : vector<1x128xf32>
    %28 = vector.broadcast %25 : vector<1x128xf32> to vector<8x128xf32>
    %29 = arith.mulf %10, %28 : vector<8x128xf32>
    %30 = vector.broadcast %27 : vector<1x128xf32> to vector<8x128xf32>
    %31 = arith.addf %29, %30 : vector<8x128xf32>
    %cst_10 = arith.constant 0.000000e+00 : f32
    %32 = vector.broadcast %cst_10 : f32 to vector<8x128xf32>
    %33 = arith.maximumf %31, %32 : vector<8x128xf32>
    %c16 = arith.constant 16 : index
    %c0_11 = arith.constant 0 : index
    %34 = vector.load %arg1[%c16, %c0_11] : memref<400x128xf32, #tpu.memory_space<vmem>>, vector<128x128xf32>
    %cst_12 = arith.constant dense<0.000000e+00> : vector<8x128xf32>
    %35 = tpu.matmul %33, %34, %cst_12 {dimension_numbers = #tpu.dot_dimension_numbers<[1], [0], [0], [1], [0, 0, 1, 1], [], []>} : vector<8x128xf32>, vector<128x128xf32>, vector<8x128xf32> -> vector<8x128xf32>
    %cst_13 = arith.constant dense<0.000000e+00> : vector<128xf32>
    %36 = vector.multi_reduction <add>, %35, %cst_13 [0] : vector<8x128xf32> to vector<128xf32>
    %37 = vector.shape_cast %36 : vector<128xf32> to vector<1x128xf32>
    %38 = arith.mulf %35, %35 : vector<8x128xf32>
    %cst_14 = arith.constant dense<0.000000e+00> : vector<128xf32>
    %39 = vector.multi_reduction <add>, %38, %cst_14 [0] : vector<8x128xf32> to vector<128xf32>
    %40 = vector.shape_cast %39 : vector<128xf32> to vector<1x128xf32>
    %cst_15 = arith.constant 1.250000e-01 : f32
    %41 = vector.broadcast %cst_15 : f32 to vector<1x128xf32>
    %42 = arith.mulf %37, %41 : vector<1x128xf32>
    %cst_16 = arith.constant 1.250000e-01 : f32
    %43 = vector.broadcast %cst_16 : f32 to vector<1x128xf32>
    %44 = arith.mulf %40, %43 : vector<1x128xf32>
    %45 = arith.mulf %42, %42 : vector<1x128xf32>
    %46 = arith.subf %44, %45 : vector<1x128xf32>
    %cst_17 = arith.constant 9.99999974E-6 : f32
    %47 = vector.broadcast %cst_17 : f32 to vector<1x128xf32>
    %48 = arith.addf %46, %47 : vector<1x128xf32>
    %49 = math.rsqrt %48 : vector<1x128xf32>
    %50 = arith.mulf %4, %49 : vector<1x128xf32>
    %51 = arith.mulf %42, %50 : vector<1x128xf32>
    %52 = arith.subf %5, %51 : vector<1x128xf32>
    %53 = vector.broadcast %50 : vector<1x128xf32> to vector<8x128xf32>
    %54 = arith.mulf %35, %53 : vector<8x128xf32>
    %55 = vector.broadcast %52 : vector<1x128xf32> to vector<8x128xf32>
    %56 = arith.addf %54, %55 : vector<8x128xf32>
    %cst_18 = arith.constant 0.000000e+00 : f32
    %57 = vector.broadcast %cst_18 : f32 to vector<8x128xf32>
    %58 = arith.maximumf %56, %57 : vector<8x128xf32>
    %c144 = arith.constant 144 : index
    %c0_19 = arith.constant 0 : index
    %59 = vector.load %arg1[%c144, %c0_19] : memref<400x128xf32, #tpu.memory_space<vmem>>, vector<128x128xf32>
    %cst_20 = arith.constant dense<0.000000e+00> : vector<8x128xf32>
    %60 = tpu.matmul %58, %59, %cst_20 {dimension_numbers = #tpu.dot_dimension_numbers<[1], [0], [0], [1], [0, 0, 1, 1], [], []>} : vector<8x128xf32>, vector<128x128xf32>, vector<8x128xf32> -> vector<8x128xf32>
    %cst_21 = arith.constant dense<0.000000e+00> : vector<128xf32>
    %61 = vector.multi_reduction <add>, %60, %cst_21 [0] : vector<8x128xf32> to vector<128xf32>
    %62 = vector.shape_cast %61 : vector<128xf32> to vector<1x128xf32>
    %63 = arith.mulf %60, %60 : vector<8x128xf32>
    %cst_22 = arith.constant dense<0.000000e+00> : vector<128xf32>
    %64 = vector.multi_reduction <add>, %63, %cst_22 [0] : vector<8x128xf32> to vector<128xf32>
    %65 = vector.shape_cast %64 : vector<128xf32> to vector<1x128xf32>
    %cst_23 = arith.constant 1.250000e-01 : f32
    %66 = vector.broadcast %cst_23 : f32 to vector<1x128xf32>
    %67 = arith.mulf %62, %66 : vector<1x128xf32>
    %cst_24 = arith.constant 1.250000e-01 : f32
    %68 = vector.broadcast %cst_24 : f32 to vector<1x128xf32>
    %69 = arith.mulf %65, %68 : vector<1x128xf32>
    %70 = arith.mulf %67, %67 : vector<1x128xf32>
    %71 = arith.subf %69, %70 : vector<1x128xf32>
    %cst_25 = arith.constant 9.99999974E-6 : f32
    %72 = vector.broadcast %cst_25 : f32 to vector<1x128xf32>
    %73 = arith.addf %71, %72 : vector<1x128xf32>
    %74 = math.rsqrt %73 : vector<1x128xf32>
    %75 = arith.mulf %6, %74 : vector<1x128xf32>
    %76 = arith.mulf %67, %75 : vector<1x128xf32>
    %77 = arith.subf %7, %76 : vector<1x128xf32>
    %78 = vector.broadcast %75 : vector<1x128xf32> to vector<8x128xf32>
    %79 = arith.mulf %60, %78 : vector<8x128xf32>
    %80 = vector.broadcast %77 : vector<1x128xf32> to vector<8x128xf32>
    %81 = arith.addf %79, %80 : vector<8x128xf32>
    %cst_26 = arith.constant 0.000000e+00 : f32
    %82 = vector.broadcast %cst_26 : f32 to vector<8x128xf32>
    %83 = arith.maximumf %81, %82 : vector<8x128xf32>
    %c272 = arith.constant 272 : index
    %c0_27 = arith.constant 0 : index
    %84 = vector.load %arg1[%c272, %c0_27] : memref<400x128xf32, #tpu.memory_space<vmem>>, vector<128x128xf32>
    %cst_28 = arith.constant dense<0.000000e+00> : vector<8x128xf32>
    %85 = tpu.matmul %83, %84, %cst_28 {dimension_numbers = #tpu.dot_dimension_numbers<[1], [0], [0], [1], [0, 0, 1, 1], [], []>} : vector<8x128xf32>, vector<128x128xf32>, vector<8x128xf32> -> vector<8x128xf32>
    %86 = vector.broadcast %8 : vector<1x128xf32> to vector<8x128xf32>
    %87 = arith.addf %85, %86 : vector<8x128xf32>
    %88 = arith.negf %87 : vector<8x128xf32>
    %89 = math.exp %88 : vector<8x128xf32>
    %cst_29 = arith.constant 1.000000e+00 : f32
    %90 = vector.broadcast %cst_29 : f32 to vector<8x128xf32>
    %91 = arith.addf %90, %89 : vector<8x128xf32>
    %92 = arith.divf %90, %91 : vector<8x128xf32>
    %c0_30 = arith.constant 0 : index
    %c0_31 = arith.constant 0 : index
    %93 = vector.load %arg3[%c0_30, %c0_31] : memref<8x128xf32, #tpu.memory_space<vmem>>, vector<8x128xf32>
    tpu.vector_store %arg3[%c0_30, %c0_31], %92 {strides = array<i32>} : memref<8x128xf32, #tpu.memory_space<vmem>>, vector<8x128xf32>,
    return
  }
}

</mosaic_0001>

<bundles_post_ra>
// kernel: tpu_custom_call.1
= control target key start
LH: loop header
LB: loop body
LE: loop exit
PB: predicated region body
PF: predicated region fallthrough
CT: control target
= control target key end

     0   :  { %8 = vsyncpa [#allocation3], 0  ;;  %s1007_s0 = inlined_call_operand.hbm [shape: f32[8,16], index: 0, kind: input, shape index: {}]   ;;  %s1008_s1 = inlined_call_operand.hbm [shape: f32[400,128], index: 1, kind: input, shape index: {}]   ;;  %s1009_s2 = inlined_call_operand.hbm [shape: f32[8,128], index: 2, kind: input, shape index: {}]   ;;  %s1010_s3 = inlined_call_operand.hbm [shape: f32[8,128], index: 3, kind: output, shape index: {}]  }
   0x1   :  { %9 = vsyncpa [#allocation6], 0 }
   0x2   :  { %10 = vsyncpa [#allocation4], 0  ;;  %s879_s12 = smov [#allocation5]   ;;  %s785_s16 = scalar_lea.hbm %s1008_s1, 6400 }
   0x3   :  { %s26_s13 = sshll.u32 %s879_s12, 4  ;;  %p786_p0 = scmp.ne.s32.totalorder %s1008_s1, %s785_s16  ;;  %s27_s13 = int_to_ptr.vmem [resolvable:$true] %s26_s13 }
   0x4   :  { %p789_p1 = scmp.lt.u32.totalorder %s785_s16, %s1008_s1 }
   0x6   :  { %p791_p2 = pnand %p789_p1, %p786_p0 }
   0x8   :  { %794 = shalt.err (!%p791_p2)
}
   0x9   :  { %s795_s21 = scalar_lea.vmem %s27_s13, 6400  ;;  %p800_p4 = scmp.lt.s32.totalorder %s27_s13, %s27_s13 }
   0xa   :  { %p796_p3 = scmp.ne.s32.totalorder %s27_s13, %s795_s21  ;;  %p801_p5 = scmp.lt.s32.totalorder %s795_s21, %s795_s21 }
   0xc   :  { %p802_p6 = por %p801_p5, %p800_p4 }
   0xe   :  { %p803_p7 = pnand %p802_p6, %p796_p3 }
  0x10   :  { %806 = shalt.err (!%p803_p7)
}
  0x11   :  { %s880_s22 = smov 128   ;;  %s881_s23 = smov 8  }
  0x12   :  { %32 = dma.hbm_to_vmem [thread:$0]  %s1008_s1, 6400, %s27_s13, [#allocation6], %s880_s22, %s880_s22, %s881_s23  }
  0x13   :  { %s882_s26 = smov [#allocation2]   ;;  %s883_s28 = smov [#allocation7]  }
  0x14   :  { %s17_s27 = sshll.u32 %s882_s26, 4  ;;  %s39_s29 = sshll.u32 %s883_s28, 4  ;;  %s18_s27 = int_to_ptr.vmem [resolvable:$true] %s17_s27  ;;  %s40_s29 = int_to_ptr.vmem [resolvable:$true] %s39_s29 }
  0x15   :  { %s807_s5 = scalar_lea.hbm %s1007_s0, 128 }
  0x16   :  { %p808_p8 = scmp.ne.s32.totalorder %s1007_s0, %s807_s5  ;;  %p811_p9 = scmp.lt.u32.totalorder %s807_s5, %s1007_s0 }
  0x18   :  { %p813_p10 = pnand %p811_p9, %p808_p8 }
  0x1a   :  { %816 = shalt.err (!%p813_p10)
}
  0x1b   :  { %s817_s1 = scalar_lea.vmem %s18_s27, 128  ;;  %p822_p12 = scmp.lt.s32.totalorder %s18_s27, %s18_s27 }
  0x1c   :  { %p818_p11 = scmp.ne.s32.totalorder %s18_s27, %s817_s1  ;;  %p823_p13 = scmp.lt.s32.totalorder %s817_s1, %s817_s1 }
  0x1e   :  { %p824_p0 = por %p823_p13, %p822_p12 }
  0x20   :  { %p825_p1 = pnand %p824_p0, %p818_p11 }
  0x22   :  { %828 = shalt.err (!%p825_p1)
}
  0x23   :  { %20 = dma.hbm_to_vmem [thread:$0]  %s1007_s0, 128, %s18_s27, [#allocation3]  }
  0x24   :  { %s829_s14 = scalar_lea.hbm %s1009_s2, 128 }
  0x25   :  { %p830_p2 = scmp.ne.s32.totalorder %s1009_s2, %s829_s14  ;;  %p833_p3 = scmp.lt.u32.totalorder %s829_s14, %s1009_s2 }
  0x27   :  { %p835_p4 = pnand %p833_p3, %p830_p2 }
  0x29   :  { %838 = shalt.err (!%p835_p4)
}
  0x2a   :  { %s839_s19 = scalar_lea.vmem %s40_s29, 128  ;;  %p844_p6 = scmp.lt.s32.totalorder %s40_s29, %s40_s29 }
  0x2b   :  { %p840_p5 = scmp.ne.s32.totalorder %s40_s29, %s839_s19  ;;  %p845_p7 = scmp.lt.s32.totalorder %s839_s19, %s839_s19 }
  0x2d   :  { %p846_p8 = por %p845_p7, %p844_p6 }
  0x2f   :  { %p847_p9 = pnand %p846_p8, %p840_p5 }
  0x31   :  { %850 = shalt.err (!%p847_p9)
}
  0x32   :  { %42 = dma.hbm_to_vmem [thread:$0]  %s1009_s2, 128, %s40_s29, [#allocation6]  }
  0x33   :  { %873 = dma.done.wait [#allocation3], 128  }
  0x34   :  { %874 = vsyncadd [#allocation3], 4294967168 }
  0x35   :  { %875 = dma.done.wait [#allocation6], 6528  }
  0x36   :  { %876 = vsyncadd [#allocation6], 4294960768  ;;  %v884_v0 = vmov 0.0|0.0   ;;  %vm885_vm0 = vmmov 0   ;;  %v886_v1 = vmov 0.0   ;;  %v54_v2 = vld [vmem:[#allocation5] sm:$0xff]  ;;  %v155_v50 = vlaneseq }
  0x37   :  { %691 = vmatprep.subr.bf16.mxu0 %v884_v0  ;;  %583 = vmatprep.mubr.msk.f32.mxu0 %vm885_vm0, %v886_v1  ;;  %v55_v3 = vld [vmem:[#allocation5 + $0x8] sm:$0xff]  ;;  %v52_v5 = vld [vmem:[#allocation2] sm:$0xff]  ;;  %vm56_vm1 = vcmask 130048   ;;  %v166_v6 = vld [vmem:[#allocation5 + $0x10] sm:$0xff]  ;;  %s887_s2 = smov [#allocation8]  }
  0x38   :  { %694 = vmatprep.subr.bf16.mxu1 %v884_v0  ;;  %618 = vmatprep.mubr.msk.f32.mxu1 %vm885_vm0, %v886_v1  ;;  %v692_v4 = vpack.c.bf16 %v55_v3, %v54_v2  ;;  %v167_v7 = vld [vmem:[#allocation5 + $0x18] sm:$0xff]  ;;  %v168_v9 = vld [vmem:[#allocation5 + $0x20] sm:$0xff]  ;;  %v169_v10 = vld [vmem:[#allocation5 + $0x28] sm:$0xff]  ;;  %v961_v51 = vshrl.u32 %v155_v50, 7  ;;  %s513_s21 = sshll.u32 %s887_s2, 4  ;;  %s514_s21 = int_to_ptr.vmem [resolvable:$true] %s513_s21 }
  0x39   :  { %v695_v8 = vpack.c.bf16 %v167_v7, %v166_v6  ;;  %v698_v11 = vpack.c.bf16 %v169_v10, %v168_v9  ;;  %v170_v12 = vld [vmem:[#allocation5 + $0x30] sm:$0xff]  ;;  %v171_v13 = vld [vmem:[#allocation5 + $0x38] sm:$0xff]  ;;  %v172_v15 = vld [vmem:[#allocation5 + $0x40] sm:$0xff]  ;;  %s851_s22 = scalar_lea.vmem %s514_s21, 128  ;;  %p856_p11 = scmp.lt.s32.totalorder %s514_s21, %s514_s21 }
  0x3a   :  { %693 = vmatpush3.bf16.msra.mxu0 %v692_v4  ;;  %v701_v14 = vpack.c.bf16 %v171_v13, %v170_v12  ;;  %v173_v16 = vld [vmem:[#allocation5 + $0x48] sm:$0xff]  ;;  %v174_v18 = vld [vmem:[#allocation5 + $0x50] sm:$0xff]  ;;  %v175_v19 = vld [vmem:[#allocation5 + $0x58] sm:$0xff]  ;;  %v157_v55 = vsub.s32 0, %v961_v51  ;;  %v162_v59 = vsub.s32 1, %v961_v51  ;;  %p852_p10 = scmp.ne.s32.totalorder %s514_s21, %s851_s22  ;;  %p857_p12 = scmp.lt.s32.totalorder %s851_s22, %s851_s22 }
  0x3b   :  { %718 = vmatprep.subr.bf16.mxu0 %v884_v0  ;;  %696 = vmatpush3.bf16.msra.mxu1 %v695_v8  ;;  %v704_v17 = vpack.c.bf16 %v173_v16, %v172_v15  ;;  %v707_v20 = vpack.c.bf16 %v175_v19, %v174_v18  ;;  %v176_v21 = vld [vmem:[#allocation5 + $0x60] sm:$0xff]  ;;  %v177_v22 = vld [vmem:[#allocation5 + $0x68] sm:$0xff]  ;;  %v178_v24 = vld [vmem:[#allocation5 + $0x70] sm:$0xff] }
  0x3c   :  { %697 = vmatprep.subr.bf16.mxu1 %v884_v0  ;;  %v710_v23 = vpack.c.bf16 %v177_v22, %v176_v21  ;;  %v179_v25 = vld [vmem:[#allocation5 + $0x78] sm:$0xff]  ;;  %v180_v26 = vld [vmem:[#allocation5 + $0x80] sm:$0xff]  ;;  %v181_v28 = vld [vmem:[#allocation5 + $0x88] sm:$0xff]  ;;  %p858_p13 = por %p857_p12, %p856_p11 }
  0x3d   :  { %584 = vmatmul.mubr.msk.f32.vlgmr.msra.gmra.mrb[0].mxu0 %vm56_vm1, %v52_v5  ;;  %v713_v27 = vpack.c.bf16 %v179_v25, %v178_v24  ;;  %v716_v29 = vpack.c.bf16 %v181_v28, %v180_v26  ;;  %v963_v52 = vld [vmem:[#allocation7] sm:$0xff]  ;;  %v289_v4 = vld [vmem:[#allocation5 + $0x98] sm:$0xff]  ;;  %v290_v6 = vld [vmem:[#allocation5 + $0xa0] sm:$0xff] }
  0x3e   :  { %653 = vmatprep.mubr.msk.f32.mxu0 %vm885_vm0, %v886_v1  ;;  %v288_v3 = vld [vmem:[#allocation5 + $0x90] sm:$0xff]  ;;  %v291_v7 = vld [vmem:[#allocation5 + $0xa8] sm:$0xff]  ;;  %v293_v10 = vld [vmem:[#allocation5 + $0xb8] sm:$0xff]  ;;  %p859_p0 = pnand %p858_p13, %p852_p10 }
  0x3f   :  { %699 = vmatpush3.bf16.msra.mxu1 %v698_v11  ;;  %v719_v5 = vpack.c.bf16 %v289_v4, %v288_v3  ;;  %v722_v8 = vpack.c.bf16 %v291_v7, %v290_v6  ;;  %v292_v9 = vld [vmem:[#allocation5 + $0xb0] sm:$0xff]  ;;  %v294_v12 = vld [vmem:[#allocation5 + $0xc0] sm:$0xff]  ;;  %v297_v15 = vld [vmem:[#allocation5 + $0xd8] sm:$0xff] }
  0x40   :  { %700 = vmatprep.subr.bf16.mxu1 %v884_v0  ;;  %v725_v11 = vpack.c.bf16 %v293_v10, %v292_v9  ;;  %v299_v18 = vld [vmem:[#allocation5 + $0xe8] sm:$0xff]  ;;  %v301_v21 = vld [vmem:[#allocation5 + $0xf8] sm:$0xff]  ;;  %v414_v4 = vld [vmem:[#allocation5 + $0x130] sm:$0xff] }
  0x41   :  { %720 = vmatpush3.bf16.msra.mxu0 %v719_v5  ;;  %v303_v24 = vld [vmem:[#allocation5 + $0x108] sm:$0xff]  ;;  %v415_v5 = vld [vmem:[#allocation5 + $0x138] sm:$0xff]  ;;  %v416_v7 = vld [vmem:[#allocation5 + $0x140] sm:$0xff] }
  0x42   :  { %721 = vmatprep.subr.bf16.mxu0 %v884_v0  ;;  %v749_v6 = vpack.c.bf16 %v415_v5, %v414_v4  ;;  %v418_v10 = vld [vmem:[#allocation5 + $0x150] sm:$0xff] }
  0x43   :  { %702 = vmatpush3.bf16.msra.mxu1 %v701_v14  ;;  %v296_v14 = vld [vmem:[#allocation5 + $0xd0] sm:$0xff] }
  0x44   :  { %703 = vmatprep.subr.bf16.mxu1 %v884_v0  ;;  %v731_v16 = vpack.c.bf16 %v297_v15, %v296_v14  ;;  %v422_v15 = vld [vmem:[#allocation5 + $0x170] sm:$0xff] }
  0x45   :  { %723 = vmatpush3.bf16.msra.mxu0 %v722_v8  ;;  %v417_v8 = vld [vmem:[#allocation5 + $0x148] sm:$0xff] }
  0x46   :  { %724 = vmatprep.subr.bf16.mxu0 %v884_v0  ;;  %v752_v9 = vpack.c.bf16 %v417_v8, %v416_v7 }
  0x47   :  { %705 = vmatpush3.bf16.msra.mxu1 %v704_v17  ;;  %v298_v17 = vld [vmem:[#allocation5 + $0xe0] sm:$0xff] }
  0x48   :  { %706 = vmatprep.subr.bf16.mxu1 %v884_v0  ;;  %v734_v19 = vpack.c.bf16 %v299_v18, %v298_v17  ;;  %v424_v18 = vld [vmem:[#allocation5 + $0x180] sm:$0xff] }
  0x49   :  { %726 = vmatpush3.bf16.msra.mxu0 %v725_v11  ;;  %v419_v11 = vld [vmem:[#allocation5 + $0x158] sm:$0xff] }
  0x4a   :  { %727 = vmatprep.subr.bf16.mxu0 %v884_v0 }
  0x4b   :  { %708 = vmatpush3.bf16.msra.mxu1 %v707_v20  ;;  %v300_v20 = vld [vmem:[#allocation5 + $0xf0] sm:$0xff] }
  0x4c   :  { %709 = vmatprep.subr.bf16.mxu1 %v884_v0  ;;  %v737_v22 = vpack.c.bf16 %v301_v21, %v300_v20 }
  0x4f   :  { %711 = vmatpush3.bf16.msra.mxu1 %v710_v23  ;;  %v302_v23 = vld [vmem:[#allocation5 + $0x100] sm:$0xff] }
  0x50   :  { %712 = vmatprep.subr.bf16.mxu1 %v884_v0  ;;  %v740_v25 = vpack.c.bf16 %v303_v24, %v302_v23 }
  0x53   :  { %714 = vmatpush3.bf16.msra.mxu1 %v713_v27 }
  0x54   :  { %715 = vmatprep.subr.bf16.mxu1 %v884_v0 }
  0x57   :  { %717 = vmatpush3.bf16.msra.mxu1 %v716_v29 }
  0x58   :  { %742 = vmatprep.subr.bf16.mxu1 %v884_v0 }
 0x110   :  { %v126_v30 = vpop.f32.mrb[0].mxu0 }
 0x111   :  { %v130_v31 = vrot.slane %v126_v30, 4  ;;  %v136_v32 = vmul.f32 %v126_v30, %v126_v30  ;;  %v585_v33 = vpop.f32.mrb[1].mxu0 }
 0x113   :  { %v131_v34 = vadd.f32 %v130_v31, %v126_v30  ;;  %v137_v35 = vrot.slane %v136_v32, 4 }
 0x115   :  { %v132_v36 = vrot.slane %v131_v34, 2  ;;  %v138_v37 = vadd.f32 %v137_v35, %v136_v32 }
 0x117   :  { %v133_v38 = vadd.f32 %v132_v36, %v131_v34  ;;  %v139_v39 = vrot.slane %v138_v37, 2 }
 0x119   :  { %v134_v40 = vrot.slane %v133_v38, 1  ;;  %v140_v41 = vadd.f32 %v139_v39, %v138_v37 }
 0x11b   :  { %v135_v42 = vadd.f32 %v134_v40, %v133_v38  ;;  %v141_v43 = vrot.slane %v140_v41, 1 }
 0x11d   :  { %v142_v44 = vadd.f32 %v141_v43, %v140_v41  ;;  %v143_v45 = vmul.f32 0.125, %v135_v42 }
 0x11f   :  { %v144_v46 = vmul.f32 0.125, %v142_v44  ;;  %v145_v47 = vmul.f32 %v143_v45, %v143_v45 }
 0x121   :  { %v146_v48 = vsub.f32 %v144_v46, %v145_v47 }
 0x123   :  { %v147_v49 = vadd.f32 1e-05, %v146_v48  ;;  %v279_v48 = vsub.s32 2, %v961_v51 }
 0x125   :  { %775 = vrsqrt.f32 %v147_v49 }
 0x12f   :  { %v776_v53 = vpop.eup %775 }
 0x130   :  { %v149_v54 = vmul.f32 %v776_v53, %v963_v52 }
 0x132   :  { %v150_v56 = vmul.f32 %v149_v54, %v143_v45  ;;  %v158_v57 = vrot.slane %v149_v54, %v157_v55  ;;  %v284_v54 = vsub.s32 3, %v961_v51 }
 0x134   :  { %v152_v58 = vrot.slane %v150_v56, 7  ;;  %v159_v61 = vmul.f32 %v158_v57, %v126_v30 }
 0x136   :  { %v154_v60 = vsub.f32 %v963_v52, %v152_v58 }
 0x138   :  { %v163_v62 = vrot.slane %v154_v60, %v162_v59  ;;  %v410_v60 = vld [vmem:[#allocation5 + $0x110] sm:$0xff] }
 0x13a   :  { %v164_v63 = vadd.f32 %v163_v62, %v159_v61  ;;  %v411_v61 = vld [vmem:[#allocation5 + $0x118] sm:$0xff] }
 0x13b   :  { %v743_v62 = vpack.c.bf16 %v411_v61, %v410_v60 }
 0x13c   :  { %v165_v2 = vmax.f32 %v164_v63, 0.0  ;;  %v412_v63 = vld [vmem:[#allocation5 + $0x120] sm:$0xff] }
 0x13e   :  { %619 = vmatmul.mubr.f32.vlgmr.msra.gmra.mrb[0].mxu1 %v165_v2  ;;  %v413_v2 = vld [vmem:[#allocation5 + $0x128] sm:$0xff] }
 0x13f   :  { %688 = vmatprep.mubr.msk.f32.mxu1 %vm885_vm0, %v886_v1  ;;  %v295_v1 = vld [vmem:[#allocation5 + $0xc8] sm:$0xff]  ;;  %744 = vmatpush3.bf16.msra.mxu1 %v743_v62  ;;  %v746_v3 = vpack.c.bf16 %v413_v2, %v412_v63 }
 0x140   :  { %v728_v13 = vpack.c.bf16 %v295_v1, %v294_v12  ;;  %745 = vmatprep.subr.bf16.mxu1 %v884_v0  ;;  %v755_v12 = vpack.c.bf16 %v419_v11, %v418_v10  ;;  %v420_v1 = vld [vmem:[#allocation5 + $0x160] sm:$0xff] }
 0x142   :  { %729 = vmatpush3.bf16.msra.mxu0 %v728_v13  ;;  %v421_v13 = vld [vmem:[#allocation5 + $0x168] sm:$0xff] }
 0x143   :  { %730 = vmatprep.subr.bf16.mxu0 %v884_v0  ;;  %747 = vmatpush3.bf16.msra.mxu1 %v746_v3  ;;  %v758_v14 = vpack.c.bf16 %v421_v13, %v420_v1 }
 0x144   :  { %748 = vmatprep.subr.bf16.mxu1 %v884_v0 }
 0x146   :  { %732 = vmatpush3.bf16.msra.mxu0 %v731_v16  ;;  %v423_v16 = vld [vmem:[#allocation5 + $0x178] sm:$0xff] }
 0x147   :  { %733 = vmatprep.subr.bf16.mxu0 %v884_v0  ;;  %750 = vmatpush3.bf16.msra.mxu1 %v749_v6  ;;  %v761_v17 = vpack.c.bf16 %v423_v16, %v422_v15 }
 0x148   :  { %751 = vmatprep.subr.bf16.mxu1 %v884_v0 }
 0x14a   :  { %735 = vmatpush3.bf16.msra.mxu0 %v734_v19  ;;  %v425_v19 = vld [vmem:[#allocation5 + $0x188] sm:$0xff] }
 0x14b   :  { %736 = vmatprep.subr.bf16.mxu0 %v884_v0  ;;  %753 = vmatpush3.bf16.msra.mxu1 %v752_v9  ;;  %v764_v20 = vpack.c.bf16 %v425_v19, %v424_v18 }
 0x14c   :  { %754 = vmatprep.subr.bf16.mxu1 %v884_v0 }
 0x14e   :  { %738 = vmatpush3.bf16.msra.mxu0 %v737_v22 }
 0x14f   :  { %739 = vmatprep.subr.bf16.mxu0 %v884_v0  ;;  %756 = vmatpush3.bf16.msra.mxu1 %v755_v12 }
 0x150   :  { %757 = vmatprep.subr.bf16.mxu1 %v884_v0 }
 0x152   :  { %741 = vmatpush3.bf16.msra.mxu0 %v740_v25 }
 0x153   :  { %759 = vmatpush3.bf16.msra.mxu1 %v758_v14 }
 0x154   :  { %760 = vmatprep.subr.bf16.mxu1 %v884_v0 }
 0x157   :  { %762 = vmatpush3.bf16.msra.mxu1 %v761_v17 }
 0x158   :  { %763 = vmatprep.subr.bf16.mxu1 %v884_v0 }
 0x15b   :  { %765 = vmatpush3.bf16.msra.mxu1 %v764_v20 }
 0x211   :  { %v248_v26 = vpop.f32.mrb[0].mxu1 }
 0x212   :  { %v252_v27 = vrot.slane %v248_v26, 4  ;;  %v258_v28 = vmul.f32 %v248_v26, %v248_v26  ;;  %v620_v29 = vpop.f32.mrb[1].mxu1 }
 0x214   :  { %v253_v30 = vadd.f32 %v252_v27, %v248_v26  ;;  %v259_v31 = vrot.slane %v258_v28, 4 }
 0x216   :  { %v254_v32 = vrot.slane %v253_v30, 2  ;;  %v260_v33 = vadd.f32 %v259_v31, %v258_v28 }
 0x218   :  { %v255_v34 = vadd.f32 %v254_v32, %v253_v30  ;;  %v261_v35 = vrot.slane %v260_v33, 2 }
 0x21a   :  { %v256_v36 = vrot.slane %v255_v34, 1  ;;  %v262_v37 = vadd.f32 %v261_v35, %v260_v33 }
 0x21c   :  { %v257_v38 = vadd.f32 %v256_v36, %v255_v34  ;;  %v263_v39 = vrot.slane %v262_v37, 1 }
 0x21e   :  { %v264_v40 = vadd.f32 %v263_v39, %v262_v37  ;;  %v265_v41 = vmul.f32 0.125, %v257_v38 }
 0x220   :  { %v266_v42 = vmul.f32 0.125, %v264_v40  ;;  %v267_v43 = vmul.f32 %v265_v41, %v265_v41 }
 0x222   :  { %v268_v44 = vsub.f32 %v266_v42, %v267_v43  ;;  %v401_v42 = vsub.s32 4, %v961_v51 }
 0x224   :  { %v269_v45 = vadd.f32 1e-05, %v268_v44 }
 0x226   :  { %777 = vrsqrt.f32 %v269_v45 }
 0x230   :  { %v778_v46 = vpop.eup %777 }
 0x231   :  { %v271_v47 = vmul.f32 %v778_v46, %v963_v52  ;;  %v406_v46 = vsub.s32 5, %v961_v51 }
 0x233   :  { %v272_v49 = vmul.f32 %v271_v47, %v265_v41  ;;  %v280_v53 = vrot.slane %v271_v47, %v279_v48 }
 0x235   :  { %v274_v50 = vrot.slane %v272_v49, 7  ;;  %v281_v56 = vmul.f32 %v280_v53, %v248_v26 }
 0x237   :  { %v276_v55 = vsub.f32 %v963_v52, %v274_v50 }
 0x239   :  { %v285_v57 = vrot.slane %v276_v55, %v284_v54  ;;  %v428_v54 = vsub.s32 6, %v961_v51 }
 0x23b   :  { %v286_v58 = vadd.f32 %v285_v57, %v281_v56  ;;  %v429_v55 = vrot.slane %v963_v52, %v428_v54 }
 0x23d   :  { %v287_v59 = vmax.f32 %v286_v58, 0.0 }
 0x23f   :  { %654 = vmatmul.mubr.f32.vlgmr.msra.gmra.mrb[2].mxu0 %v287_v59 }
 0x312   :  { %v370_v21 = vpop.f32.mrb[2].mxu0 }
 0x313   :  { %v374_v22 = vrot.slane %v370_v21, 4  ;;  %v380_v23 = vmul.f32 %v370_v21, %v370_v21  ;;  %v655_v24 = vpop.f32.mrb[3].mxu0 }
 0x315   :  { %v375_v25 = vadd.f32 %v374_v22, %v370_v21  ;;  %v381_v26 = vrot.slane %v380_v23, 4 }
 0x317   :  { %v376_v27 = vrot.slane %v375_v25, 2  ;;  %v382_v28 = vadd.f32 %v381_v26, %v380_v23 }
 0x319   :  { %v377_v29 = vadd.f32 %v376_v27, %v375_v25  ;;  %v383_v30 = vrot.slane %v382_v28, 2 }
 0x31b   :  { %v378_v31 = vrot.slane %v377_v29, 1  ;;  %v384_v32 = vadd.f32 %v383_v30, %v382_v28 }
 0x31d   :  { %v379_v33 = vadd.f32 %v378_v31, %v377_v29  ;;  %v385_v34 = vrot.slane %v384_v32, 1 }
 0x31f   :  { %v386_v35 = vadd.f32 %v385_v34, %v384_v32  ;;  %v387_v0 = vmul.f32 0.125, %v379_v33 }
 0x321   :  { %v388_v36 = vmul.f32 0.125, %v386_v35  ;;  %v389_v37 = vmul.f32 %v387_v0, %v387_v0 }
 0x323   :  { %v390_v38 = vsub.f32 %v388_v36, %v389_v37 }
 0x325   :  { %v391_v39 = vadd.f32 1e-05, %v390_v38 }
 0x327   :  { %779 = vrsqrt.f32 %v391_v39 }
 0x331   :  { %v780_v40 = vpop.eup %779 }
 0x332   :  { %v393_v41 = vmul.f32 %v780_v40, %v963_v52 }
 0x334   :  { %v394_v43 = vmul.f32 %v393_v41, %v387_v0  ;;  %v402_v45 = vrot.slane %v393_v41, %v401_v42 }
 0x336   :  { %v396_v44 = vrot.slane %v394_v43, 7  ;;  %v403_v48 = vmul.f32 %v402_v45, %v370_v21 }
 0x338   :  { %v398_v47 = vsub.f32 %v963_v52, %v396_v44 }
 0x33a   :  { %v407_v49 = vrot.slane %v398_v47, %v406_v46 }
 0x33c   :  { %v408_v50 = vadd.f32 %v407_v49, %v403_v48 }
 0x33e   :  { %v409_v53 = vmax.f32 %v408_v50, 0.0 }
 0x340   :  { %689 = vmatmul.mubr.f32.vlgmr.msra.gmra.mrb[2].mxu1 %v409_v53 }
 0x413   :  { %v496_v56 = vpop.f32.mrb[2].mxu1 }
 0x414   :  { %v497_v57 = vadd.f32 %v496_v56, %v429_v55  ;;  %v690_v58 = vpop.f32.mrb[3].mxu1 }
 0x416   :  { %v524_v59 = vmul.f32 -1.442695, %v497_v57 }
 0x418   :  { %781 = vpow2.f32 %v524_v59 }
 0x422   :  { %v782_v60 = vpop.eup %781 }
 0x423   :  { %v503_v61 = vadd.f32 1.0, %v782_v60 }
 0x425   :  { %783 = vrcp.f32 %v503_v61 }
 0x42f   :  { %v784_v62 = vpop.eup %783 }
 0x430   :  { %506 = vst [vmem:[#allocation8] sm:$0xff] %v784_v62 }
 0x431   :  { %862 = shalt.err (!%p859_p0)
}
 0x432   :  { %s863_s25 = scalar_lea.hbm %s1010_s3, 128 }
 0x433   :  { %p864_p1 = scmp.ne.s32.totalorder %s1010_s3, %s863_s25  ;;  %p867_p2 = scmp.lt.u32.totalorder %s863_s25, %s1010_s3 }
 0x435   :  { %p869_p3 = pnand %p867_p2, %p864_p1 }
 0x437   :  { %872 = shalt.err (!%p869_p3)
}
 0x438   :  { %516 = dma.vmem_to_hbm [thread:$0]  %s514_s21, 128, %s1010_s3, [#allocation4]  }
 0x439   :  { %877 = dma.done.wait [#allocation4], 128  }
 0x43a   :  { %878 = vsyncadd [#allocation4], 4294967168 }
 0x43b   :  { %520 = vsyncpa [#allocation3], 1 }
 0x43c   :  { %521 = vsyncpa [#allocation6], 1 }
 0x43d   :  { %522 = vsyncpa [#allocation4], 1 }

</bundles_post_ra>
